<compile_context>
chip_gen: v6e
topology: v6e:2x2x1
jax: 0.10.0
libtpu: 0.0.40
codegen_flags: <defaults>
</compile_context>

<pallas_src>
import functools

import jax
import jax.numpy as jnp
from jax.experimental import pallas as pl
from jax.experimental.pallas import tpu as pltpu


_VPU_FC1_MAX_STATE_DIM = 16  # below this K, skip the MXU for fc1 entirely


def _round_up(x, m):
    return ((x + m - 1) // m) * m


def _valuenet_kernel(x_ref, w1_ref, b1_ref, w2_ref, b2_ref, o_ref, *,
                     mxu_input_dtype):
    """One batch tile of: relu(x @ W1 + b1) . w2 + b2  -> (TB, 1).

    x_ref:  (TB, S)  VMEM   (streamed per grid step)
    w1_ref: (S, H)   VMEM   (constant index map -> resident across steps)
    b1_ref: (1, H)   VMEM   (resident)
    w2_ref: (1, H)   VMEM   (fc2 weight as a row; resident)
    b2_ref: (1, 1)   SMEM   (scalar)
    o_ref:  (TB, 1)  VMEM
    """
    x = x_ref[...]
    w1 = w1_ref[...]
    S = x.shape[1]

    if S <= _VPU_FC1_MAX_STATE_DIM:
        # state_dim is tiny: a K=S matmul would use ~S/128 of the MXU K dim.
        # Do the contraction as a statically unrolled VPU multiply-add.
        h = x[:, 0:1] * w1[0:1, :]
        for s in range(1, S):
            h = h + x[:, s:s + 1] * w1[s:s + 1, :]
    else:
        # MXU path; optionally feed bf16 operands (v6e/v7x) while keeping an
        # f32 accumulator. Bias add / ReLU stay in f32 (v5e VPU has no bf16).
        xm = x.astype(mxu_input_dtype)
        wm = w1.astype(mxu_input_dtype)
        h = jnp.dot(xm, wm, preferred_element_type=jnp.float32)

    h = h + b1_ref[...]
    h = jnp.maximum(h, jnp.float32(0.0))

    # fc2 (H -> 1): VPU multiply + lane reduction, plus the SMEM scalar bias.
    out = jnp.sum(h * w2_ref[...], axis=-1, keepdims=True) + b2_ref[0, 0]
    # TODO(synk): output last-dim=1 -> masked partial stores; a lane-dense
    # (grid, TB) output slab would avoid them, but output bytes are negligible.
    o_ref[...] = out.astype(o_ref.dtype)


def value_net_forward(state, w1, b1, w2, b2, *, max_tile_b=1024,
                      mxu_input_dtype=jnp.float32):
    """Fused ValueNet forward pass.

    Args:
      state: (B, state_dim) float32
      w1:    (state_dim, hidden_dim) float32  (transposed vs torch fc1.weight)
      b1:    (1, hidden_dim) float32
      w2:    (hidden_dim, 1) float32          (transposed vs torch fc2.weight)
      b2:    (1, 1) float32
      max_tile_b: max rows per grid step (multiple of 8; ~1024 keeps the
        double-buffered f32 tiles well under v7x's 32 MiB scoped VMEM even
        after lane padding).
      mxu_input_dtype: operand dtype for the fc1 MXU path (use jnp.bfloat16 on
        v6e/v7x to halve state HBM traffic; accumulation stays f32).
    Returns:
      (B, 1) float32 value estimates.
    """
    B, S = state.shape
    H = w1.shape[1]

    w2_row = w2.reshape(1, H)      # (H, 1) -> (1, H): lane-major fc2 weight
    b2_smem = b2.reshape(1, 1)

    max_tile_b = max(8, (int(max_tile_b) // 8) * 8)
    tile_b = min(max_tile_b, _round_up(B, 8))
    b_pad = _round_up(B, tile_b)
    if b_pad != B:
        state = jnp.pad(state, ((0, b_pad - B), (0, 0)))
    grid = (b_pad // tile_b,)

    kernel = functools.partial(_valuenet_kernel, mxu_input_dtype=mxu_input_dtype)

    out = pl.pallas_call(
        kernel,
        out_shape=jax.ShapeDtypeStruct((b_pad, 1), jnp.float32),
        grid=grid,
        in_specs=[
            pl.BlockSpec((tile_b, S), lambda i: (i, 0)),   # state: streamed
            pl.BlockSpec((S, H), lambda i: (0, 0)),        # W1: VMEM-resident
            pl.BlockSpec((1, H), lambda i: (0, 0)),        # b1: VMEM-resident
            pl.BlockSpec((1, H), lambda i: (0, 0)),        # w2 row: resident
            pl.BlockSpec(memory_space=pltpu.SMEM),         # b2: SMEM scalar
        ],
        out_specs=pl.BlockSpec((tile_b, 1), lambda i: (i, 0)),
        compiler_params=pltpu.CompilerParams(
            # Batch tiles are independent -> shard across v7x's 2 TCs;
            # harmless on single-TC v5e/v6e.
            dimension_semantics=("parallel",),
        ),
    )(state, w1, b1, w2_row, b2_smem)

    return out[:B]


def init_value_net_params(key, state_dim, hidden_dim):
    """Param init matching PyTorch Linear default (uniform +-1/sqrt(fan_in))."""
    k1, k2, k3, k4 = jax.random.split(key, 4)
    bound1 = 1.0 / jnp.sqrt(jnp.float32(state_dim))
    bound2 = 1.0 / jnp.sqrt(jnp.float32(hidden_dim))
    w1 = jax.random.uniform(k1, (state_dim, hidden_dim), jnp.float32, -bound1, bound1)
    b1 = jax.random.uniform(k2, (1, hidden_dim), jnp.float32, -bound1, bound1)
    w2 = jax.random.uniform(k3, (hidden_dim, 1), jnp.float32, -bound2, bound2)
    b2 = jax.random.uniform(k4, (1, 1), jnp.float32, -bound2, bound2)
    return w1, b1, w2, b2


if __name__ == "__main__":
    key = jax.random.PRNGKey(0)
    k_params, k_state, k_state2 = jax.random.split(key, 3)

    state_dim, hidden_dim = 4, 32
    w1, b1, w2, b2 = init_value_net_params(k_params, state_dim, hidden_dim)

    def ref_fn(s):
        return jnp.maximum(s @ w1 + b1, 0.0) @ w2 + b2

    # Small-batch path (single grid step).
    B = 8
    state = jax.random.normal(k_state, (B, state_dim), jnp.float32)
    out = jax.block_until_ready(value_net_forward(state, w1, b1, w2, b2))
    assert out.shape == (B, 1)
    assert jnp.allclose(out, ref_fn(state), atol=1e-5, rtol=1e-5), "mismatch (B=8)"

    # Multi-tile grid path: B=100 pads to 128 rows -> 4 parallel tiles of 32,
    # exercising the batch grid, resident-weight index maps and pad/slice.
    B2 = 100
    state2 = jax.random.normal(k_state2, (B2, state_dim), jnp.float32)
    out2 = jax.block_until_ready(
        value_net_forward(state2, w1, b1, w2, b2, max_tile_b=32))
    assert out2.shape == (B2, 1)
    assert jnp.allclose(out2, ref_fn(state2), atol=1e-5, rtol=1e-5), "mismatch (B=100)"

    print("KERNEL_OK")
</pallas_src>

<mosaic_0001>
module attributes {stable_mosaic.version = 11 : i64} {
  func.func @_valuenet_kernel(%arg0: i32, %arg1: memref<8x4xf32, #tpu.memory_space<vmem>>, %arg2: memref<4x32xf32, #tpu.memory_space<vmem>>, %arg3: memref<1x32xf32, #tpu.memory_space<vmem>>, %arg4: memref<1x32xf32, #tpu.memory_space<vmem>>, %arg5: memref<1x1xf32, #tpu.memory_space<smem>>, %arg6: memref<8x1xf32, #tpu.memory_space<vmem>>) attributes {dimension_semantics = [#tpu.dimension_semantics<parallel>], iteration_bounds = array<i64: 1>, scalar_prefetch = 0 : i64, scratch_operands = 0 : i64, tpu.core_type = #tpu.core_type<tc>, window_params = [{transform_indices = @transform_0, window_bounds = array<i64: 8, 4>}, {pipeline_mode = #tpu.pipeline_mode<synchronous>, transform_indices = @transform_1, window_bounds = array<i64: 4, 32>}, {pipeline_mode = #tpu.pipeline_mode<synchronous>, transform_indices = @transform_2, window_bounds = array<i64: 1, 32>}, {pipeline_mode = #tpu.pipeline_mode<synchronous>, transform_indices = @transform_3, window_bounds = array<i64: 1, 32>}, {transform_indices = @transform_4, window_bounds = array<i64: 1, 1>}, {transform_indices = @transform_5, window_bounds = array<i64: 8, 1>}]} {
    %c0 = arith.constant 0 : index
    %c0_0 = arith.constant 0 : index
    %0 = vector.load %arg1[%c0, %c0_0] : memref<8x4xf32, #tpu.memory_space<vmem>>, vector<8x4xf32>
    %c0_1 = arith.constant 0 : index
    %c0_2 = arith.constant 0 : index
    %1 = vector.load %arg2[%c0_1, %c0_2] : memref<4x32xf32, #tpu.memory_space<vmem>>, vector<4x32xf32>
    %2 = vector.extract_strided_slice %0 {offsets = [0, 0], sizes = [8, 1], strides = [1, 1]} : vector<8x4xf32> to vector<8x1xf32>
    %3 = vector.extract_strided_slice %1 {offsets = [0, 0], sizes = [1, 32], strides = [1, 1]} : vector<4x32xf32> to vector<1x32xf32>
    %4 = vector.broadcast %2 : vector<8x1xf32> to vector<8x32xf32>
    %5 = vector.broadcast %3 : vector<1x32xf32> to vector<8x32xf32>
    %6 = arith.mulf %4, %5 : vector<8x32xf32>
    %7 = vector.extract_strided_slice %0 {offsets = [0, 1], sizes = [8, 1], strides = [1, 1]} : vector<8x4xf32> to vector<8x1xf32>
    %8 = vector.extract_strided_slice %1 {offsets = [1, 0], sizes = [1, 32], strides = [1, 1]} : vector<4x32xf32> to vector<1x32xf32>
    %9 = vector.broadcast %7 : vector<8x1xf32> to vector<8x32xf32>
    %10 = vector.broadcast %8 : vector<1x32xf32> to vector<8x32xf32>
    %11 = arith.mulf %9, %10 : vector<8x32xf32>
    %12 = arith.addf %6, %11 : vector<8x32xf32>
    %13 = vector.extract_strided_slice %0 {offsets = [0, 2], sizes = [8, 1], strides = [1, 1]} : vector<8x4xf32> to vector<8x1xf32>
    %14 = vector.extract_strided_slice %1 {offsets = [2, 0], sizes = [1, 32], strides = [1, 1]} : vector<4x32xf32> to vector<1x32xf32>
    %15 = vector.broadcast %13 : vector<8x1xf32> to vector<8x32xf32>
    %16 = vector.broadcast %14 : vector<1x32xf32> to vector<8x32xf32>
    %17 = arith.mulf %15, %16 : vector<8x32xf32>
    %18 = arith.addf %12, %17 : vector<8x32xf32>
    %19 = vector.extract_strided_slice %0 {offsets = [0, 3], sizes = [8, 1], strides = [1, 1]} : vector<8x4xf32> to vector<8x1xf32>
    %20 = vector.extract_strided_slice %1 {offsets = [3, 0], sizes = [1, 32], strides = [1, 1]} : vector<4x32xf32> to vector<1x32xf32>
    %21 = vector.broadcast %19 : vector<8x1xf32> to vector<8x32xf32>
    %22 = vector.broadcast %20 : vector<1x32xf32> to vector<8x32xf32>
    %23 = arith.mulf %21, %22 : vector<8x32xf32>
    %24 = arith.addf %18, %23 : vector<8x32xf32>
    %c0_3 = arith.constant 0 : index
    %c0_4 = arith.constant 0 : index
    %25 = vector.load %arg3[%c0_3, %c0_4] : memref<1x32xf32, #tpu.memory_space<vmem>>, vector<1x32xf32>
    %26 = vector.broadcast %25 : vector<1x32xf32> to vector<8x32xf32>
    %27 = arith.addf %24, %26 : vector<8x32xf32>
    %cst = arith.constant 0.000000e+00 : f32
    %28 = vector.broadcast %cst : f32 to vector<8x32xf32>
    %29 = arith.maximumf %27, %28 : vector<8x32xf32>
    %c0_5 = arith.constant 0 : index
    %c0_6 = arith.constant 0 : index
    %30 = vector.load %arg4[%c0_5, %c0_6] : memref<1x32xf32, #tpu.memory_space<vmem>>, vector<1x32xf32>
    %31 = vector.broadcast %30 : vector<1x32xf32> to vector<8x32xf32>
    %32 = arith.mulf %29, %31 : vector<8x32xf32>
    %cst_7 = arith.constant dense<0.000000e+00> : vector<8xf32>
    %33 = vector.multi_reduction <add>, %32, %cst_7 [1] : vector<8x32xf32> to vector<8xf32>
    %34 = vector.shape_cast %33 : vector<8xf32> to vector<8x1xf32>
    %c0_8 = arith.constant 0 : index
    %c0_9 = arith.constant 0 : index
    %35 = memref.load %arg5[%c0_8, %c0_9] : memref<1x1xf32, #tpu.memory_space<smem>>
    %36 = vector.broadcast %35 : f32 to vector<8x1xf32>
    %37 = arith.addf %34, %36 : vector<8x1xf32>
    %c0_10 = arith.constant 0 : index
    %c0_11 = arith.constant 0 : index
    %38 = vector.load %arg6[%c0_10, %c0_11] : memref<8x1xf32, #tpu.memory_space<vmem>>, vector<8x1xf32>
    tpu.vector_store %arg6[%c0_10, %c0_11], %37 {strides = array<i32>} : memref<8x1xf32, #tpu.memory_space<vmem>>, vector<8x1xf32>,
    return
  }
  func.func @transform_0(%arg0: i32) -> (i32, i32) {
    %c0_i32 = arith.constant 0 : i32
    %c0_i32_0 = arith.constant 0 : i32
    return %arg0, %c0_i32 : i32, i32
  }
  func.func @transform_1(%arg0: i32) -> (i32, i32) {
    %c0_i32 = arith.constant 0 : i32
    %c0_i32_0 = arith.constant 0 : i32
    %c0_i32_1 = arith.constant 0 : i32
    return %c0_i32, %c0_i32_0 : i32, i32
  }
  func.func @transform_2(%arg0: i32) -> (i32, i32) {
    %c0_i32 = arith.constant 0 : i32
    %c0_i32_0 = arith.constant 0 : i32
    %c0_i32_1 = arith.constant 0 : i32
    return %c0_i32, %c0_i32_0 : i32, i32
  }
  func.func @transform_3(%arg0: i32) -> (i32, i32) {
    %c0_i32 = arith.constant 0 : i32
    %c0_i32_0 = arith.constant 0 : i32
    %c0_i32_1 = arith.constant 0 : i32
    return %c0_i32, %c0_i32_0 : i32, i32
  }
  func.func @transform_4(%arg0: i32) -> (i32, i32) {
    %c0_i32 = arith.constant 0 : i32
    %c0_i32_0 = arith.constant 0 : i32
    %c0_i32_1 = arith.constant 0 : i32
    return %c0_i32, %c0_i32_0 : i32, i32
  }
  func.func @transform_5(%arg0: i32) -> (i32, i32) {
    %c0_i32 = arith.constant 0 : i32
    %c0_i32_0 = arith.constant 0 : i32
    return %arg0, %c0_i32 : i32, i32
  }
}

</mosaic_0001>

<bundles_post_ra>
// kernel: tpu_custom_call.1
= control target key start
LH: loop header
LB: loop body
LE: loop exit
PB: predicated region body
PF: predicated region fallthrough
CT: control target
= control target key end

     0   :  { %v104_v0 = vmov 0   ;;  %v105_v2 = vmov 2   ;;  %v106_v3 = vmov 1   ;;  %v107_v4 = vmov 3   ;;  %s156_s0 = inlined_call_operand.vmem [shape: f32[8,4], index: 0, kind: input, shape index: {}]   ;;  %s157_s1 = inlined_call_operand.vmem [shape: f32[4,32], index: 1, kind: input, shape index: {}]   ;;  %s158_s2 = inlined_call_operand.vmem [shape: f32[1,32], index: 2, kind: input, shape index: {}]   ;;  %s159_s3 = inlined_call_operand.vmem [shape: f32[1,32], index: 3, kind: input, shape index: {}]   ;;  %s160_s4 = inlined_call_operand.<no memory space> [shape: f32[1,1], index: 4, kind: input, shape index: {}]   ;;  %s161_s5 = inlined_call_operand.vmem [shape: f32[8,1], index: 5, kind: output, shape index: {}]  }
   0x1   :  { %99 = vset.pattern.permute.xlu0 %v104_v0  ;;  %v21_v1 = vld [vmem:[%s156_s0] sm:$0xff]  ;;  %101 = vset.pattern.permute.xlu1 %v105_v2  ;;  %v28_v5 = vlaneseq  ;;  %vm80_vm0 = vcmask 261120   ;;  %v85_v33 = vstv %s160_s4  ;;  %vm87_vm1 = vcmask 7168  }
   0x2   :  { %25 = vperm.xlu0 %99, %v21_v1   ;;  %44 = vperm.xlu1 %101, %v21_v1   ;;  %v22_v9 = vld [vmem:[%s157_s1] sm:$0xf] }
   0x3   :  { %v29_v6 = vshrl.u32 %v28_v5, 7  ;;  %v93_v26 = vld [vmem:[%s158_s2] ss:$0 sm:$0xff] }
   0x4   :  { %v94_v29 = vld [vmem:[%s159_s3] ss:$0 sm:$0xff] }
   0x5   :  { %v30_v7 = vsub.s32 0, %v29_v6  ;;  %v39_v8 = vsub.s32 1, %v29_v6  ;;  %v49_v11 = vsub.s32 2, %v29_v6  ;;  %v59_v13 = vsub.s32 3, %v29_v6 }
   0x6   :  { %100 = vset.pattern.permute.xlu0 %v106_v3  ;;  %102 = vset.pattern.permute.xlu1 %v107_v4 }
   0x7   :  { %34 = vperm.xlu0 %100, %v21_v1   ;;  %54 = vperm.xlu1 %102, %v21_v1   ;;  %v31_v14 = vrot.slane %v22_v9, %v30_v7  ;;  %v40_v15 = vrot.slane %v22_v9, %v39_v8  ;;  %v50_v16 = vrot.slane %v22_v9, %v49_v11 }
   0x8   :  { %v60_v17 = vrot.slane %v22_v9, %v59_v13 }
   0xb   :  { %103 = vset.pattern.permute.xlu0 %v107_v4 }
  0x7d   :  { %v26_v10 = vpop.permute.xlu0 %25  ;;  %v45_v12 = vpop.permute.xlu1 %44 }
  0x7e   :  { %v32_v20 = vmul.f32 %v31_v14, %v26_v10  ;;  %v51_v22 = vmul.f32 %v50_v16, %v45_v12 }
  0x82   :  { %v35_v18 = vpop.permute.xlu0 %34  ;;  %v55_v19 = vpop.permute.xlu1 %54 }
  0x83   :  { %v41_v21 = vmul.f32 %v40_v15, %v35_v18  ;;  %v61_v24 = vmul.f32 %v60_v17, %v55_v19 }
  0x85   :  { %v42_v23 = vadd.f32 %v41_v21, %v32_v20 }
  0x87   :  { %v52_v25 = vadd.f32 %v51_v22, %v42_v23 }
  0x89   :  { %v62_v27 = vadd.f32 %v61_v24, %v52_v25 }
  0x8b   :  { %v70_v28 = vadd.f32 %v93_v26, %v62_v27 }
  0x8d   :  { %v71_v30 = vmax.f32 %v70_v28, 0.0 }
  0x8f   :  { %v79_v31 = vmul.f32 %v94_v29, %v71_v30 }
  0x91   :  { %v81_v32 = vsel %vm80_vm0, %v79_v31, 0.0 }
  0x92   :  { %82 = vadd.xlane.f32.xlu1 %v81_v32 }
 0x11b   :  { %v83_v34 = vpop.xlane.xlu1 %82 }
 0x11c   :  { %v86_v35 = vadd.f32 %v85_v33, %v83_v34 }
 0x11e   :  { %88 = vst.msk [vmem:[%s161_s5] sm:$0xff] %vm87_vm1, %v86_v35 }

</bundles_post_ra>
